<compile_context>
chip_gen: v5e
topology: v5e:2x2
jax: 0.10.0
libtpu: 0.0.40
codegen_flags: <defaults>
</compile_context>

<pallas_src>
import functools

import jax
import jax.numpy as jnp
from jax.experimental import pallas as pl
from jax.experimental.pallas import tpu as pltpu


NUM_CORE_SPLITS = 2              # "parallel" row split: 2 TCs on v7x, harmless elsewhere
_TARGET_BLOCK_BYTES = 8 << 20    # combined pred+target bytes per (single-buffer) block
_MAX_ROW_TILE = 4096


def _soft_ce_kernel(pred_ref, tgt_ref, out_ref, acc_ref, *,
                    total_rows, row_tile, tiles_total, tiles_per_core):
    c = pl.program_id(0)          # core-split index ("parallel")
    j = pl.program_id(1)          # row-tile index within this split ("arbitrary")

    @pl.when(j == 0)
    def _():
        acc_ref[...] = jnp.zeros_like(acc_ref)

    x = pred_ref[...].astype(jnp.float32)     # (row_tile, C)
    t = tgt_ref[...].astype(jnp.float32)      # (row_tile, C)

    # log_softmax(x) = x - m - lse, with m = max(x), lse = log(sum(exp(x - m)))
    # => sum_c(-t * log_softmax(x)) = (m + lse) * sum_c(t) - sum_c(t * x)
    m = jnp.max(x, axis=-1, keepdims=True)                               # (rt, 1)
    lse = jnp.log(jnp.sum(jnp.exp(x - m), axis=-1, keepdims=True))       # (rt, 1)
    sum_t = jnp.sum(t, axis=-1, keepdims=True)                           # (rt, 1)
    sum_tx = jnp.sum(t * x, axis=-1, keepdims=True)                      # (rt, 1)
    row_loss = (m + lse) * sum_t - sum_tx                                # (rt, 1)

    # Mask rows past the end of the batch: partial final tile, and tail grid
    # steps whose (clamped) block was already handled by another step.
    unclamped_blk = c * tiles_per_core + j
    clamped_blk = jnp.minimum(unclamped_blk, tiles_total - 1)
    row_ids = clamped_blk * row_tile + jax.lax.broadcasted_iota(
        jnp.int32, (row_tile, 1), 0)
    valid = (unclamped_blk < tiles_total) & (row_ids < total_rows)

    acc_ref[...] += jnp.where(valid, row_loss, 0.0)

    @pl.when(j == tiles_per_core - 1)
    def _():
        # Broadcast this core's partial sum into its tile-aligned output block.
        out_ref[...] = jnp.zeros_like(out_ref) + jnp.sum(acc_ref[...])


def soft_target_cross_entropy(pred: jax.Array, target: jax.Array,
                              row_tile: int | None = None) -> jax.Array:
    """Equivalent of SoftTargetCrossEntropy().forward(pred, target).

    pred, target: (..., C) with matching shapes (softmax over the last axis,
    mean over all leading axes). Returns a float32 scalar.
    """
    assert pred.shape == target.shape and pred.ndim >= 1
    C = int(pred.shape[-1])
    B = int(pred.size) // C
    pred2 = pred.reshape(B, C)
    tgt2 = target.reshape(B, C)

    in_itemsize = pred2.dtype.itemsize + tgt2.dtype.itemsize
    # Sublane granularity: 8 for 4-byte, 16 for 2-byte, 32 for 1-byte dtypes.
    g = max(32 // pred2.dtype.itemsize, 32 // tgt2.dtype.itemsize)

    if row_tile is None:
        rt = _TARGET_BLOCK_BYTES // max(1, C * in_itemsize)
        rt = max(g, min(_MAX_ROW_TILE, (rt // g) * g))
        rows_per_split = pl.cdiv(B, NUM_CORE_SPLITS)
        rt = min(rt, max(g, pl.cdiv(rows_per_split, g) * g))
        if B < g:
            rt = B                      # block equals full batch dim
        row_tile = rt
    assert row_tile == B or row_tile % g == 0

    tiles_total = pl.cdiv(B, row_tile)
    tiles_per_core = pl.cdiv(tiles_total, NUM_CORE_SPLITS)
    grid = (NUM_CORE_SPLITS, tiles_per_core)

    def in_index_map(c, j):
        # Clamp so tail steps of the last core never index past the array;
        # those steps are fully masked inside the kernel.
        return (jnp.minimum(c * tiles_per_core + j, tiles_total - 1), 0)

    # VMEM budget: 2x double-buffered input blocks + padded accumulator + slack.
    c_pad = pl.cdiv(C, 128) * 128
    block_bytes = row_tile * c_pad * in_itemsize
    vmem_limit = 2 * block_bytes + row_tile * 128 * 4 + (8 << 20)
    vmem_limit = int(min(max(vmem_limit, 16 << 20), 56 << 20))

    cost = pl.CostEstimate(
        flops=5 * B * C,
        transcendentals=B * C,
        bytes_accessed=B * C * in_itemsize + NUM_CORE_SPLITS * 8 * 128 * 4,
    )

    out = pl.pallas_call(
        functools.partial(
            _soft_ce_kernel,
            total_rows=B,
            row_tile=row_tile,
            tiles_total=tiles_total,
            tiles_per_core=tiles_per_core,
        ),
        out_shape=jax.ShapeDtypeStruct((NUM_CORE_SPLITS, 8, 128), jnp.float32),
        grid_spec=pltpu.PrefetchScalarGridSpec(
            num_scalar_prefetch=0,
            grid=grid,
            in_specs=[
                pl.BlockSpec((row_tile, C), in_index_map),
                pl.BlockSpec((row_tile, C), in_index_map),
            ],
            out_specs=pl.BlockSpec((1, 8, 128), lambda c, j: (c, 0, 0)),
            scratch_shapes=[pltpu.VMEM((row_tile, 1), jnp.float32)],
        ),
        compiler_params=pltpu.CompilerParams(
            dimension_semantics=("parallel", "arbitrary"),
            vmem_limit_bytes=vmem_limit,
        ),
        cost_estimate=cost,
    )(pred2, tgt2)

    partials = out[:, 0, 0]                        # one partial sum per core split
    return jnp.sum(partials) / jnp.float32(B)


def _reference(pred, target):
    logp = jax.nn.log_softmax(pred.astype(jnp.float32), axis=-1)
    return jnp.mean(jnp.sum(-target.astype(jnp.float32) * logp, axis=-1))


if __name__ == "__main__":
    key = jax.random.PRNGKey(0)
    k1, k2, k3, k4 = jax.random.split(key, 4)

    # Case 1: small aligned shape, f32 (auto row_tile).
    B, C = 16, 32
    pred = jax.random.normal(k1, (B, C), dtype=jnp.float32)
    target = jax.nn.softmax(jax.random.normal(k2, (B, C), dtype=jnp.float32), axis=-1)
    loss = jax.block_until_ready(soft_target_cross_entropy(pred, target))
    ref = _reference(pred, target)
    assert jnp.allclose(loss, ref, rtol=1e-4, atol=1e-4), (loss, ref)

    # Case 2: ragged batch (B not a multiple of the tile), bf16 logits, explicit
    # small row_tile so the partial-tile / out-of-range-tail masking paths run.
    B2, C2 = 36, 40
    pred_b = jax.random.normal(k3, (B2, C2), dtype=jnp.bfloat16)
    target_b = jax.nn.softmax(jax.random.normal(k4, (B2, C2), dtype=jnp.float32), axis=-1)
    loss2 = jax.block_until_ready(
        soft_target_cross_entropy(pred_b, target_b, row_tile=16))
    ref2 = _reference(pred_b, target_b)
    assert jnp.allclose(loss2, ref2, rtol=1e-3, atol=1e-3), (loss2, ref2)

    print("KERNEL_OK")
</pallas_src>

<mosaic_0001>
module attributes {stable_mosaic.version = 11 : i64} {
  func.func @_soft_ce_kernel(%arg0: i32, %arg1: i32, %arg2: memref<8x32xf32, #tpu.memory_space<vmem>>, %arg3: memref<8x32xf32, #tpu.memory_space<vmem>>, %arg4: memref<1x8x128xf32, #tpu.memory_space<vmem>>, %arg5: memref<8x1xf32, #tpu.memory_space<vmem>>) attributes {dimension_semantics = [#tpu.dimension_semantics<parallel>, #tpu.dimension_semantics<arbitrary>], iteration_bounds = array<i64: 2, 1>, scalar_prefetch = 0 : i64, scratch_operands = 1 : i64, tpu.core_type = #tpu.core_type<tc>, window_params = [{transform_indices = @transform_0, window_bounds = array<i64: 8, 32>}, {transform_indices = @transform_1, window_bounds = array<i64: 8, 32>}, {transform_indices = @transform_2, window_bounds = array<i64: 1, 8, 128>}]} {
    %c0_i32 = arith.constant 0 : i32
    %0 = arith.cmpi eq, %arg1, %c0_i32 : i32
    %1 = arith.extui %0 : i1 to i32
    %c0_i32_0 = arith.constant 0 : i32
    %2 = arith.cmpi ne, %1, %c0_i32_0 : i32
    scf.if %2 {
      %cst_15 = arith.constant 0.000000e+00 : f32
      %41 = vector.broadcast %cst_15 : f32 to vector<8x1xf32>
      %c0_16 = arith.constant 0 : index
      %c0_17 = arith.constant 0 : index
      %42 = vector.load %arg5[%c0_16, %c0_17] : memref<8x1xf32, #tpu.memory_space<vmem>>, vector<8x1xf32>
      tpu.vector_store %arg5[%c0_16, %c0_17], %41 {strides = array<i32>} : memref<8x1xf32, #tpu.memory_space<vmem>>, vector<8x1xf32>,
    } else {
    }
    %c0 = arith.constant 0 : index
    %c0_1 = arith.constant 0 : index
    %3 = vector.load %arg2[%c0, %c0_1] : memref<8x32xf32, #tpu.memory_space<vmem>>, vector<8x32xf32>
    %c0_2 = arith.constant 0 : index
    %c0_3 = arith.constant 0 : index
    %4 = vector.load %arg3[%c0_2, %c0_3] : memref<8x32xf32, #tpu.memory_space<vmem>>, vector<8x32xf32>
    %cst = arith.constant dense<0xFF800000> : vector<8xf32>
    %5 = vector.multi_reduction <maximumf>, %3, %cst [1] : vector<8x32xf32> to vector<8xf32>
    %6 = vector.shape_cast %5 : vector<8xf32> to vector<8x1xf32>
    %7 = vector.broadcast %6 : vector<8x1xf32> to vector<8x32xf32>
    %8 = arith.subf %3, %7 : vector<8x32xf32>
    %9 = math.exp %8 : vector<8x32xf32>
    %cst_4 = arith.constant dense<0.000000e+00> : vector<8xf32>
    %10 = vector.multi_reduction <add>, %9, %cst_4 [1] : vector<8x32xf32> to vector<8xf32>
    %11 = vector.shape_cast %10 : vector<8xf32> to vector<8x1xf32>
    %12 = math.log %11 : vector<8x1xf32>
    %cst_5 = arith.constant dense<0.000000e+00> : vector<8xf32>
    %13 = vector.multi_reduction <add>, %4, %cst_5 [1] : vector<8x32xf32> to vector<8xf32>
    %14 = vector.shape_cast %13 : vector<8xf32> to vector<8x1xf32>
    %15 = arith.mulf %4, %3 : vector<8x32xf32>
    %cst_6 = arith.constant dense<0.000000e+00> : vector<8xf32>
    %16 = vector.multi_reduction <add>, %15, %cst_6 [1] : vector<8x32xf32> to vector<8xf32>
    %17 = vector.shape_cast %16 : vector<8xf32> to vector<8x1xf32>
    %18 = arith.addf %6, %12 : vector<8x1xf32>
    %19 = arith.mulf %18, %14 : vector<8x1xf32>
    %20 = arith.subf %19, %17 : vector<8x1xf32>
    %c1_i32 = arith.constant 1 : i32
    %21 = arith.muli %arg0, %c1_i32 : i32
    %22 = arith.addi %21, %arg1 : i32
    %c1_i32_7 = arith.constant 1 : i32
    %23 = arith.minsi %22, %c1_i32_7 : i32
    %c8_i32 = arith.constant 8 : i32
    %24 = arith.muli %23, %c8_i32 : i32
    %25 = tpu.iota {dimensions = array<i32: 0>} : vector<8x1xi32>
    %26 = vector.broadcast %24 : i32 to vector<8x1xi32>
    %27 = arith.addi %26, %25 : vector<8x1xi32>
    %c2_i32 = arith.constant 2 : i32
    %28 = arith.cmpi slt, %22, %c2_i32 : i32
    %c16_i32 = arith.constant 16 : i32
    %29 = vector.broadcast %c16_i32 : i32 to vector<8x1xi32>
    %30 = arith.cmpi slt, %27, %29 : vector<8x1xi32>
    %31 = vector.broadcast %28 : i1 to vector<8x1xi1>
    %32 = arith.andi %31, %30 : vector<8x1xi1>
    %c0_8 = arith.constant 0 : index
    %c0_9 = arith.constant 0 : index
    %33 = vector.load %arg5[%c0_8, %c0_9] : memref<8x1xf32, #tpu.memory_space<vmem>>, vector<8x1xf32>
    %cst_10 = arith.constant 0.000000e+00 : f32
    %34 = vector.broadcast %cst_10 : f32 to vector<8x1xf32>
    %35 = arith.select %32, %20, %34 : vector<8x1xi1>, vector<8x1xf32>
    %36 = arith.addf %33, %35 : vector<8x1xf32>
    %c0_11 = arith.constant 0 : index
    %c0_12 = arith.constant 0 : index
    %37 = vector.load %arg5[%c0_11, %c0_12] : memref<8x1xf32, #tpu.memory_space<vmem>>, vector<8x1xf32>
    tpu.vector_store %arg5[%c0_11, %c0_12], %36 {strides = array<i32>} : memref<8x1xf32, #tpu.memory_space<vmem>>, vector<8x1xf32>,
    %c0_i32_13 = arith.constant 0 : i32
    %38 = arith.cmpi eq, %arg1, %c0_i32_13 : i32
    %39 = arith.extui %38 : i1 to i32
    %c0_i32_14 = arith.constant 0 : i32
    %40 = arith.cmpi ne, %39, %c0_i32_14 : i32
    scf.if %40 {
      %cst_15 = arith.constant 0.000000e+00 : f32
      %41 = vector.broadcast %cst_15 : f32 to vector<1x8x128xf32>
      %c0_16 = arith.constant 0 : index
      %c0_17 = arith.constant 0 : index
      %42 = vector.load %arg5[%c0_16, %c0_17] : memref<8x1xf32, #tpu.memory_space<vmem>>, vector<8x1xf32>
      %43 = vector.shape_cast %42 : vector<8x1xf32> to vector<1x8x1xf32>
      %cst_18 = arith.constant dense<0.000000e+00> : vector<1xf32>
      %44 = vector.multi_reduction <add>, %43, %cst_18 [1, 2] : vector<1x8x1xf32> to vector<1xf32>
      %45 = vector.shape_cast %44 : vector<1xf32> to vector<1x1x1xf32>
      %46 = vector.extract %45[0, 0, 0] : f32 from vector<1x1x1xf32>
      %47 = vector.broadcast %46 : f32 to vector<1x8x128xf32>
      %48 = arith.addf %41, %47 : vector<1x8x128xf32>
      %c0_19 = arith.constant 0 : index
      %c0_20 = arith.constant 0 : index
      %c0_21 = arith.constant 0 : index
      %49 = vector.load %arg4[%c0_19, %c0_20, %c0_21] : memref<1x8x128xf32, #tpu.memory_space<vmem>>, vector<1x8x128xf32>
      tpu.vector_store %arg4[%c0_19, %c0_20, %c0_21], %48 {strides = array<i32>} : memref<1x8x128xf32, #tpu.memory_space<vmem>>, vector<1x8x128xf32>,
    } else {
    }
    return
  }
  func.func @transform_0(%arg0: i32, %arg1: i32) -> (i32, i32) {
    %c1_i32 = arith.constant 1 : i32
    %0 = arith.muli %arg0, %c1_i32 : i32
    %1 = arith.addi %0, %arg1 : i32
    %c1_i32_0 = arith.constant 1 : i32
    %2 = arith.minsi %1, %c1_i32_0 : i32
    %c0_i32 = arith.constant 0 : i32
    %c0_i32_1 = arith.constant 0 : i32
    return %2, %c0_i32 : i32, i32
  }
  func.func @transform_1(%arg0: i32, %arg1: i32) -> (i32, i32) {
    %c1_i32 = arith.constant 1 : i32
    %0 = arith.muli %arg0, %c1_i32 : i32
    %1 = arith.addi %0, %arg1 : i32
    %c1_i32_0 = arith.constant 1 : i32
    %2 = arith.minsi %1, %c1_i32_0 : i32
    %c0_i32 = arith.constant 0 : i32
    %c0_i32_1 = arith.constant 0 : i32
    return %2, %c0_i32 : i32, i32
  }
  func.func @transform_2(%arg0: i32, %arg1: i32) -> (i32, i32, i32) {
    %c0_i32 = arith.constant 0 : i32
    %c0_i32_0 = arith.constant 0 : i32
    %c0_i32_1 = arith.constant 0 : i32
    return %arg0, %c0_i32, %c0_i32_0 : i32, i32, i32
  }
}

</mosaic_0001>

<bundles_post_ra>
// kernel: tpu_custom_call.1
= control target key start
LH: loop header
LB: loop body
LE: loop exit
PB: predicated region body
PF: predicated region fallthrough
CT: control target
= control target key end

     0   :  { %s887_s0 = inlined_call_operand.hbm [shape: f32[16,32], index: 0, kind: input, shape index: {}]   ;;  %s888_s1 = inlined_call_operand.hbm [shape: f32[16,32], index: 1, kind: input, shape index: {}]   ;;  %s889_s2 = inlined_call_operand.hbm [shape: f32[2,8,128], index: 2, kind: output, shape index: {}]  }
   0x1   :  { %892 = sst [smem:[#allocation14_spill]] %s887_s0 }
   0x2   :  { %7 = vsyncpa [#allocation4], 0 }
   0x3   :  { %9 = vsyncpa [#allocation4 + $0x1], 0 }
   0x4   :  { %10 = vsyncpa [#allocation7], 0 }
   0x5   :  { %12 = vsyncpa [#allocation7 + $0x1], 0 }
   0x6   :  { %13 = vsyncpa [#allocation5], 0 }
   0x7   :  { %15 = vsyncpa [#allocation5 + $0x1], 0  ;;  %s722_s9 = smov 0   ;;  %s724_s10 = smov 0  }
   0x8   :  { %s726_s11 = smov 0   ;;  %s728_s12 = smov 0  }
   0x9   :  { %s730_s13 = smov 0   ;;  %s732_s14 = smov 0  }
   0xa   :  { %s734_s15 = smov 0   ;;  %s736_s16 = smov 0  }
   0xb   :  { %s738_s17 = smov 0  }
   0xc LB: > { %893 = sst [smem:[#allocation12_spill]] %s700_s16  ;;  %s419_s18 = sadd.s32 4294967295, %s704_s17   ;;  %s704_s17 = sphi %s738_s17, %s21_s17   ;;  %s700_s16 = sphi %s736_s16, %s901_s16   ;;  %s696_s15 = sphi %s734_s15, %s900_s15   ;;  %s692_s14 = sphi %s732_s14, %s907_s14   ;;  %s688_s13 = sphi %s730_s13, %s906_s13   ;;  %s684_s12 = sphi %s728_s12, %s905_s12   ;;  %s680_s11 = sphi %s726_s11, %s904_s11   ;;  %s676_s10 = sphi %s724_s10, %s903_s10   ;;  %s672_s9 = sphi %s722_s9, %s902_s9  }
   0xd   : > { %s420_s19 = sadd.s32 4294967294, %s704_s17   ;;  %s33_s20 = sadd.s32 1, %s700_s16 }
   0xe   : > { %p38_p0 = scmp.lt.s32.totalorder %s700_s16, 1  ;;  %p35_p1 = scmp.ge.s32.totalorder %s33_s20, 2 }
   0xf   : > { %s46_s21 = sadd.s32 1, %s692_s14  ;;  %p53_p2 = scmp.ne.s32.totalorder %s692_s14, %s688_s13 }
  0x10   : > { %s771_s22 = scalar_select %p38_p0, %s700_s16, 1 }
  0x11   : > { %s909_s20 = smov (%p35_p1, %s33_s20), 0  ;;  %p54_p3 = scmp.eq.s32.totalorder %s704_s17, 0 }
  0x12   : > { %894 = sst [smem:[#allocation13_spill]] %s909_s20  ;;  %p41_p4 = scmp.lt.s32.totalorder %s909_s20, 1 }
  0x13   : > { %p59_p5 = scmp.ne.s32.totalorder %s688_s13, %s684_s12  ;;  %p780_p6 = por %p54_p3, %p53_p2 }
  0x14   : > { %p60_p7 = scmp.eq.s32.totalorder %s419_s18, 0  ;;  %s101_s26 = ssub.s32 %s700_s16, %s909_s20 }
  0x15   : > { %s42_s24 = scalar_select %p41_p4, %s909_s20, 1 }
  0x16   : > { %p785_p8 = por %p60_p7, %p59_p5  ;;  %p102_p9 = scmp.eq.s32.totalorder %s101_s26, 0 }
  0x17   : > { %s43_s27 = ssub.s32 %s771_s22, %s42_s24  ;;  %s104_s28 = sadd.s32 1, %s680_s11 }
  0x18   : > { %p44_p10 = scmp.eq.s32.totalorder %s43_s27, 0  ;;  %p114_p11 = scmp.ne.s32.totalorder %s680_s11, %s676_s10 }
  0x19   : > { %s794_s29 = scalar_select %p102_p9, %s680_s11, %s104_s28  }
  0x1a   : > { %s797_s30 = scalar_select %p44_p10, %s692_s14, %s46_s21  }
  0x1b   : > { %p115_p12 = scmp.eq.s32.totalorder %s419_s18, 1  ;;  %p120_p13 = scmp.ne.s32.totalorder %s676_s10, %s672_s9 }
  0x1c   : > { %p121_p0 = scmp.eq.s32.totalorder %s420_s19, 1  ;;  %p422_p2 = scmp.ge.s32.totalorder %s704_s17, 2 }
  0x1d   : > { %p803_p1 = por %p115_p12, %p114_p11  ;;  %p455_p4 = scmp.lt.s32.totalorder %s704_s17, 2 }
  0x1e   : > { %p808_p3 = por %p121_p0, %p120_p13  ;;  %s141_s5 = sand.u32 1, %s692_s14  }
  0x1f   : > { %s424_s6 = sshll.u32 %s771_s22, 3  ;;  %s423_s7 = sshll.u32 %s141_s5, 3 }
  0x20   : > { %s899_s0 = sld [smem:[#allocation14_spill]]  ;;  %s145_s19 = scalar_lea.vmem [#allocation3], %s423_s7 }
  0x21   : > { %s156_s24 = sshll.u32 %s145_s19, 4  ;;  %p445_p5 = pnand %p455_p4, %p780_p6  ;;  %s157_s24 = int_to_ptr.vmem [resolvable:$true] %s156_s24 }
  0x22   : > { %p427_p7 = scmp.ge.s32.totalorder %s704_s17, 1  ;;  %p183_p9 = scmp.lt.s32.totalorder %s704_s17, 3 }
  0x23   : > { %s142_s26 = scalar_lea.sflag [#allocation4], %s141_s5  ;;  %s174_s22 = scalar_lea.hbm %s888_s1, %s424_s6 }
  0x24   : > { %p184_p10 = pnand %p427_p7, %p183_p9  ;;  %s176_s20 = sshll.u32 %s174_s22, 4  ;;  %s177_s20 = int_to_ptr.hbm [resolvable:$true] %s176_s20 }
  0x25   : > { %s167_s16 = scalar_lea.vmem [#allocation6], %s423_s7  ;;  %s164_s12 = scalar_lea.sflag [#allocation7], %s141_s5 }
  0x26   : > { %s152_s18 = scalar_lea.hbm %s899_s0, %s424_s6  ;;  %s178_s8 = sshll.u32 %s167_s16, 4  ;;  %s179_s8 = int_to_ptr.vmem [resolvable:$true] %s178_s8 }
  0x27   : > { %s154_s21 = sshll.u32 %s152_s18, 4  ;;  %187 = sbr.rel (%p184_p10) target bundleno = 503 (0x1f7), region = 28  ;;  %s155_s21 = int_to_ptr.hbm [resolvable:$true] %s154_s21 }
  0x28   : > { %447 = dma.hbm_to_vmem [thread:$0]  (!%p445_p5), %s155_s21, 128, %s157_s24, %s142_s26  }
  0x29   : > { %450 = dma.hbm_to_vmem [thread:$0]  (!%p445_p5), %s177_s20, 128, %s179_s8, %s164_s12  }
  0x2a   : > { %s189_s23 = sand.u32 (!%p184_p10), 1, %s688_s13  }
  0x2b   : > { %s428_s18 = sshll.u32 (!%p184_p10), %s189_s23, 3  ;;  %s190_s19 = scalar_lea.sflag (!%p184_p10), [#allocation4], %s189_s23 }
  0x2c   : > { %s193_s0 = scalar_lea.vmem [#allocation3], %s428_s18 }
  0x2d   : > { %659 = dma.done.wait (%p785_p8), %s190_s19, 128  }
  0x2e   : > { %661 = vsyncadd (%p785_p8), %s190_s19, 4294967168  ;;  %s200_s6 = scalar_lea.sflag [#allocation7], %s189_s23  ;;  %s203_s7 = scalar_lea.vmem [#allocation6], %s428_s18 }
  0x2f   : > { %663 = dma.done.wait (%p785_p8), %s200_s6, 128  }
  0x30   : > { %665 = vsyncadd (%p785_p8), %s200_s6, 4294967168  ;;  %vm244_vm0 = vcmask 261120   ;;  %v242_v0 = vld [vmem:[%s193_s0] sm:$0xff]  ;;  %v243_v2 = vld [vmem:[%s203_s7] sm:$0xff]  ;;  %vm240_vm1 = vcmask 7168   ;;  %v706_v11 = vmov 0.0   ;;  %v270_v12 = vlaneseq }
  0x31   : > { %v245_v1 = vsel %vm244_vm0, %v242_v0, -inf  ;;  %v256_v3 = vsel %vm244_vm0, %v243_v2, 0.0  ;;  %v259_v4 = vmul.f32 %v243_v2, %v242_v0  ;;  %241 = vst.msk [vmem:[#allocation2] sm:$0xff] %vm240_vm1, %v706_v11  ;;  %p267_p6 = scmp.lt.s32.totalorder %s696_s15, 1  ;;  %p274_p8 = scmp.lt.s32.totalorder %s696_s15, 2 }
  0x32   : > { %246 = vmax.xlane.f32.xlu0 %v245_v1  ;;  %257 = vadd.xlane.f32.xlu1 %v256_v3  ;;  %v271_v15 = vshrl.u32 %v270_v12, 7  ;;  %s227_s25 = sand.u32 1, %s676_s10   ;;  %s433_s21 = sshll.u32 %s696_s15, 3 }
  0x33   : > { %v260_v5 = vsel %vm244_vm0, %v259_v4, 0.0  ;;  %s268_s0 = scalar_select %p267_p6, %s696_s15, 1 }
  0x34   : > { %s276_s20 = scalar_select %p274_p8, 1, 0 }
  0x35   : > { %s431_s16 = sshll.u32 %s268_s0, 3  ;;  %s430_s5 = sshll.u32 %s227_s25, 3 }
  0x36   : > { %v272_v16 = vstv %s431_s16  ;;  %v277_v19 = vstv %s276_s20  ;;  %s313_s27 = scalar_lea.hbm %s889_s2, %s433_s21  ;;  %s229_s28 = scalar_lea.vmem [#allocation8], %s430_s5 }
  0x37   : > { %v273_v17 = vadd.s32 %v272_v16, %v271_v15  ;;  %vm278_vm3 = vcmp.eq.s32.totalorder %v277_v19, 1  ;;  %s315_s22 = sshll.u32 %s229_s28, 4  ;;  %s317_s8 = sshll.u32 %s313_s27, 4  ;;  %s316_s22 = int_to_ptr.vmem [resolvable:$true] %s315_s22  ;;  %s318_s8 = int_to_ptr.hbm [resolvable:$true] %s317_s8 }
  0x38   : > { %v280_v25 = vld [vmem:[#allocation2] sm:$0xff]  ;;  %s303_s23 = scalar_lea.sflag [#allocation5], %s227_s25  ;;  %s608_s18 = sshra.s32 %s318_s8, 4  ;;  %s609_s18 = int_to_ptr.hbm [resolvable:$true] %s608_s18 }
  0x39   : > { %vm275_vm2 = vcmp.lt.s32.totalorder %v273_v17, 16  ;;  %s610_s19 = scalar_lea.hbm %s609_s18, 8  ;;  %s614_s7 = scalar_lea.hbm %s889_s2, 16 }
  0x3a   : > { %261 = vadd.xlane.f32.xlu1 %v260_v5  ;;  %vm279_vm4 = vmand %vm278_vm3, %vm275_vm2  ;;  %p611_p11 = scmp.ne.s32.totalorder %s609_s18, %s610_s19  ;;  %p615_p0 = scmp.lt.s32.totalorder %s609_s18, %s889_s2 }
  0x3b   : > { %p616_p4 = scmp.lt.s32.totalorder %s614_s7, %s610_s19 }
  0x3c   : > { %p612_p12 = pnand %p611_p11, %p803_p1 }
  0x3d   : > { %p617_p5 = por %p616_p4, %p615_p0 }
  0x3e   : > { %p613_p13 = pneg %p612_p12 }
  0x40   : > { %p618_p7 = pnand %p617_p5, %p613_p13 }
  0xa5   : > { %v247_v6 = vpop.xlane.xlu0 %246  ;;  %v258_v14 = vpop.xlane.xlu1 %257 }
  0xa6   : > { %v248_v7 = vsub.f32 %v242_v0, %v247_v6 }
  0xa8   : > { %v249_v8 = vmul.f32 1.442695, %v248_v7 }
  0xaa   : > { %530 = vpow2.f32 %v249_v8 }
  0xad   : > { %v262_v22 = vpop.xlane.xlu1 %261 }
  0xb0   : > { %v531_v9 = vpop.eup %530 }
  0xb1   : > { %v251_v10 = vsel %vm244_vm0, %v531_v9, 0.0 }
  0xb2   : > { %252 = vadd.xlane.f32.xlu0 %v251_v10 }
 0x125   : > { %v253_v13 = vpop.xlane.xlu0 %252 }
 0x126   : > { %532 = vlog2.f32 %v253_v13 }
 0x12c   : > { %v533_v18 = vpop.eup %532 }
 0x12d   : > { %v255_v20 = vmul.f32 0.6931472, %v533_v18 }
 0x12f   : > { %v263_v21 = vadd.f32 %v255_v20, %v247_v6 }
 0x131   : > { %v264_v23 = vmul.f32 %v263_v21, %v258_v14 }
 0x133   : > { %v265_v24 = vsub.f32 %v264_v23, %v262_v22 }
 0x135   : > { %v281_v26 = vsel %vm279_vm4, %v265_v24, 0.0 }
 0x136   : > { %v282_v27 = vadd.f32 %v281_v26, %v280_v25 }
 0x138   : > { %284 = vst.msk [vmem:[#allocation2] sm:$0xff] %vm240_vm1, %v282_v27 }
 0x13f   : > { %v288_v28 = vld [vmem:[#allocation2] sm:$0xff] }
 0x140   : > { %v289_v29 = vsel %vm240_vm1, %v288_v28, 0.0 }
 0x141   : > { %290 = vadd.xlane.f32.xlu2 %v289_v29 }
 0x1b4   : > { %v291_v30 = vpop.xlane.xlu2 %290 }
 0x1b5   : > { %v292_v31 = vrot.slane %v291_v30, 4 }
 0x1b7   : > { %v293_v32 = vadd.f32 %v292_v31, %v291_v30 }
 0x1b9   : > { %v294_v33 = vrot.slane %v293_v32, 2 }
 0x1bb   : > { %v295_v34 = vadd.f32 %v294_v33, %v293_v32 }
 0x1bd   : > { %v296_v35 = vrot.slane %v295_v34, 1 }
 0x1bf   : > { %v297_v36 = vadd.f32 %v296_v35, %v295_v34 }
 0x1c1   : > { %436 = vpush %v297_v36 }
 0x1f2   : > { %s437_s12 = spop %436 }
 0x1f3   : > { %v299_v37 = vstv %s437_s12 }
 0x1f4   : > { %301 = vst [vmem:[%s229_s28] sm:$0xff] %v299_v37 }
 0x1f5   : > { %621 = shalt.err (!%p618_p7)
}
 0x1f6   : > { %442 = dma.vmem_to_hbm [thread:$0]  (%p803_p1), %s316_s22, 128, %s318_s8, %s303_s23  }
 0x1f7 PF: > { %s329_s20 = sand.u32 1, %s672_s9   ;;  %p452_p9 = pnand %p422_p2, %p808_p3 }
 0x1f8   : > { %s330_s25 = scalar_lea.sflag [#allocation5], %s329_s20 }
 0x1f9   : > { %p453_p10 = pneg %p452_p9 }
 0x1fb   : > { %667 = dma.done.wait (%p453_p10), %s330_s25, 128  }
 0x1fc   : > { %669 = vsyncadd (%p453_p10), %s330_s25, 4294967168  ;;  %s21_s17 = sadd.s32 1, %s704_s17   ;;  %s900_s15 = sld [smem:[#allocation12_spill]] }
 0x1fd   : > { %p18_p6 = scmp.ge.s32.totalorder %s21_s17, 4   ;;  %s901_s16 = sld [smem:[#allocation13_spill]] }
 0x1fe   : > { %s902_s9 = smov %s676_s10  ;;  %s903_s10 = smov %s680_s11 }
 0x1ff   : > { %s904_s11 = smov %s794_s29  ;;  %s905_s12 = smov %s688_s13 }
 0x200   : > { %s906_s13 = smov %s692_s14  ;;  %s907_s14 = smov %s797_s30 }
 0x201   :  { %20 = sbr.rel (!%p18_p6) target bundleno = 12 (0xc), region = 94 }
 0x206   :  { %336 = vsyncpa [#allocation4], 1 }
 0x207   :  { %338 = vsyncpa [#allocation4 + $0x1], 1 }
 0x208   :  { %339 = vsyncpa [#allocation7], 1 }
 0x209   :  { %341 = vsyncpa [#allocation7 + $0x1], 1 }
 0x20a   :  { %342 = vsyncpa [#allocation5], 1 }
 0x20b   :  { %344 = vsyncpa [#allocation5 + $0x1], 1 }

</bundles_post_ra>
